<compile_context>
chip_gen: v7x
topology: tpu7x:2x2x1
jax: 0.10.0
libtpu: 0.0.40
codegen_flags: <defaults>
</compile_context>

<pallas_src>
import functools

import jax
import jax.numpy as jnp
from jax.experimental import pallas as pl
from jax.experimental.pallas import tpu as pltpu


def _round8(n):
    """Round a channel count up to the sublane granularity (8)."""
    return max(8, ((n + 7) // 8) * 8)


def _mlpconv_kernel(x_ref, w_ref, b_ref, o_ref, *, couts, c_in, ep_dtype):
    """Fused pointwise-conv MLP on one position-tile block.

    x_ref: (C, TM) or (1, C, TM)   positions on lanes, channels on sublanes
    w_ref: (L, CMAX, CMAX)         zero-padded (Cout, Cin) weights, all layers
    b_ref: (L, CMAX, 1)            zero-padded f32 biases
    o_ref: (OUT, TM) or (1, OUT, TM)
    """
    h = x_ref[0] if len(x_ref.shape) == 3 else x_ref[...]      # (C, TM)
    w_dt = w_ref.dtype
    rows = c_in                       # real (padded-to-8) row count of h
    n_layers = len(couts)
    out = None
    for k in range(n_layers):         # unrolled at trace time
        co = couts[k]
        co_p = co if k == n_layers - 1 else _round8(co)
        w = w_ref[k, :co_p, :rows]    # static slice of the packed block
        acc = jnp.dot(w, h.astype(w_dt),
                      preferred_element_type=jnp.float32)      # f32 accumulation
        b = b_ref[k, :co_p]           # (co_p, 1), lane-broadcast
        if k < n_layers - 1:
            # bias + ReLU epilogue in the compute dtype (bf16 on v6e/v7x).
            h = jnp.maximum(acc.astype(ep_dtype) + b.astype(ep_dtype), 0)
            rows = co_p
        else:
            out = (acc + b).astype(o_ref.dtype)   # final bias in f32, no ReLU

    if len(o_ref.shape) == 3:
        o_ref[0] = out
    else:
        o_ref[...] = out


def pack_mlpconv_params(weights, biases, *, weight_dtype=jnp.bfloat16):
    """Pack per-layer (Cout, Cin) weights / (Cout,) biases into two padded blocks.

    Weights default to bf16 (MXU-native on every TPU generation, halves HBM
    traffic); biases stay f32 (tiny, keeps the last-layer bias exact).
    Zero padding is mathematically exact through bias + ReLU.
    """
    n_layers = len(weights)
    c_max = _round8(max(max(w.shape) for w in weights))
    wp = jnp.zeros((n_layers, c_max, c_max), weight_dtype)
    bp = jnp.zeros((n_layers, c_max, 1), jnp.float32)
    for k, (w, b) in enumerate(zip(weights, biases)):
        co, ci = w.shape
        wp = wp.at[k, :co, :ci].set(w.astype(weight_dtype))
        bp = bp.at[k, :co, 0].set(b.astype(jnp.float32))
    return wp, bp


def _pick_tile(m, target):
    """Lane-axis position tile.

    Full array when it already fits in 128 lanes (cannot subdivide further);
    otherwise a 128-aligned tile, capped at `target` and at ~ceil(m/2) so the
    grid keeps at least two "parallel" blocks (both v7x TensorCores busy;
    harmless on single-core v5e/v6e).
    """
    if m <= 128:
        return m
    half = (((m + 1) // 2) + 127) // 128 * 128
    return max(128, min(target, half))


def create_level_forward(x, w_packed, b_packed, *, output_channels, tarch_level,
                         tn=4096, epilogue_dtype=None, fold_batch_below=512):
    """Fused CreateLevel forward.  x: (B, C, N) as in torch Conv1d.

    Returns (B, output_channels, tarch_level * N).
    On v5e pass epilogue_dtype=jnp.float32 (no bf16 VALU there).
    """
    B, C, N = x.shape
    n_layers, c_max, _ = w_packed.shape
    out_dim = output_channels * tarch_level
    # Channel schedule fixed by the module definition.
    couts = (C, C // 2, C // 4, C // 8, out_dim)
    assert n_layers == len(couts), (n_layers, couts)
    assert out_dim <= c_max

    if epilogue_dtype is None:
        epilogue_dtype = (jnp.bfloat16 if w_packed.dtype == jnp.bfloat16
                          else jnp.float32)

    kernel = functools.partial(_mlpconv_kernel, couts=couts, c_in=C,
                               ep_dtype=epilogue_dtype)

    cins = (C,) + couts[:-1]
    flops = int(2 * B * N * sum(co * ci for co, ci in zip(couts, cins)))
    bytes_accessed = int(B * N * (C + out_dim) * x.dtype.itemsize
                         + w_packed.size * w_packed.dtype.itemsize
                         + b_packed.size * b_packed.dtype.itemsize)
    cost = pl.CostEstimate(flops=flops, transcendentals=0,
                           bytes_accessed=bytes_accessed)

    # Constant index_maps: Pallas skips the re-DMA when the block index repeats.
    w_spec = pl.BlockSpec((n_layers, c_max, c_max), lambda *_: (0, 0, 0))
    b_spec = pl.BlockSpec((n_layers, c_max, 1), lambda *_: (0, 0, 0))

    if N < fold_batch_below:
        # Small N: fold batch into the lane axis so loads/stores are lane-dense.
        # The wrapper transposes touch only small arrays here.
        m = B * N
        tm = _pick_tile(m, tn)
        xr = jnp.transpose(x, (1, 0, 2)).reshape(C, m)
        y = pl.pallas_call(
            kernel,
            out_shape=jax.ShapeDtypeStruct((out_dim, m), x.dtype),
            grid=(pl.cdiv(m, tm),),
            in_specs=[pl.BlockSpec((C, tm), lambda j: (0, j)), w_spec, b_spec],
            out_specs=pl.BlockSpec((out_dim, tm), lambda j: (0, j)),
            compiler_params=pltpu.CompilerParams(
                dimension_semantics=("parallel",)),
            cost_estimate=cost,
        )(xr, w_packed, b_packed)
        y = jnp.transpose(y.reshape(out_dim, B, N), (1, 0, 2))   # (B, out_dim, N)
    else:
        # Large N: keep the native (B, C, N) layout (no wrapper HBM passes).
        tm = _pick_tile(N, tn)
        y = pl.pallas_call(
            kernel,
            out_shape=jax.ShapeDtypeStruct((B, out_dim, N), x.dtype),
            grid=(B, pl.cdiv(N, tm)),
            in_specs=[pl.BlockSpec((1, C, tm), lambda b, j: (b, 0, j)),
                      w_spec, b_spec],
            out_specs=pl.BlockSpec((1, out_dim, tm), lambda b, j: (b, 0, j)),
            compiler_params=pltpu.CompilerParams(
                dimension_semantics=("parallel", "parallel")),
            cost_estimate=cost,
        )(x, w_packed, b_packed)

    # torch: features.view(B, out_ch, -1) on a contiguous (B, out_dim, N)
    return y.reshape(B, output_channels, -1)


def _reference_forward(x, weights, biases, output_channels):
    """Pure-JAX reference of the PyTorch forward (for verification)."""
    B, C, N = x.shape
    h = x.astype(jnp.float32)
    n = len(weights)
    for k, (w, b) in enumerate(zip(weights, biases)):
        h = jnp.einsum('oc,bcn->bon', w, h,
                       precision=jax.lax.Precision.HIGHEST) + b[None, :, None]
        if k < n - 1:
            h = jnp.maximum(h, 0.0)
    return h.reshape(B, output_channels, -1)


def init_params(key, input_channels, output_channels, tarch_level):
    """Deterministic synthetic params for the 5 pointwise convs, (Cout, Cin) form."""
    c = input_channels
    dims = [c, c, c // 2, c // 4, c // 8, output_channels * tarch_level]
    weights, biases = [], []
    keys = jax.random.split(key, 2 * (len(dims) - 1))
    for i in range(len(dims) - 1):
        cin, cout = dims[i], dims[i + 1]
        scale = 1.0 / jnp.sqrt(jnp.float32(cin))
        w = jax.random.uniform(keys[2 * i], (cout, cin), jnp.float32,
                               minval=-scale, maxval=scale)
        b = jax.random.uniform(keys[2 * i + 1], (cout,), jnp.float32,
                               minval=-scale, maxval=scale)
        weights.append(w)
        biases.append(b)
    return weights, biases


if __name__ == "__main__":
    root_key = jax.random.PRNGKey(0)

    def run_case(seed, B, C, N, out_ch, tarch, io_dtype, weight_dtype, tol,
                 epilogue_dtype=None):
        k_x, k_p = jax.random.split(jax.random.fold_in(root_key, seed))
        x = jax.random.normal(k_x, (B, C, N), jnp.float32)
        weights, biases = init_params(k_p, C, out_ch, tarch)
        w_p, b_p = pack_mlpconv_params(weights, biases, weight_dtype=weight_dtype)
        fwd = jax.jit(functools.partial(create_level_forward,
                                        output_channels=out_ch,
                                        tarch_level=tarch,
                                        epilogue_dtype=epilogue_dtype))
        y = fwd(x.astype(io_dtype), w_p, b_p)
        jax.block_until_ready(y)
        y_ref = _reference_forward(x, weights, biases, out_ch)
        assert y.shape == (B, out_ch, tarch * N), (y.shape, (B, out_ch, tarch * N))
        yf = y.astype(jnp.float32)
        err = float(jnp.max(jnp.abs(yf - y_ref)))
        assert jnp.allclose(yf, y_ref, atol=tol, rtol=tol), err
        return y

    # Primary demo (module-scale small shapes): B=2, C=32, N=16, out_ch=4,
    # tarch=8 -> bf16 fast path (loose tol: bf16 operands + bf16 epilogue).
    run_case(0, B=2, C=32, N=16, out_ch=4, tarch=8,
             io_dtype=jnp.bfloat16, weight_dtype=jnp.bfloat16, tol=1e-1)

    # f32 path, folded-batch layout, ragged last tile, out_dim != c_max and not
    # a multiple of 8 (exercises the real-row slicing + OOB masking paths).
    run_case(1, B=2, C=32, N=300, out_ch=2, tarch=5,
             io_dtype=jnp.float32, weight_dtype=jnp.float32, tol=3e-2,
             epilogue_dtype=jnp.float32)

    # f32 path, native (B, C, N) layout (N >= 512), ragged last tile.
    run_case(2, B=2, C=32, N=650, out_ch=4, tarch=8,
             io_dtype=jnp.float32, weight_dtype=jnp.float32, tol=3e-2,
             epilogue_dtype=jnp.float32)

    print("KERNEL_OK")
</pallas_src>

<mosaic_0001>
module attributes {stable_mosaic.version = 11 : i64} {
  func.func @_mlpconv_kernel(%arg0: i32, %arg1: memref<32x32xbf16, #tpu.memory_space<vmem>>, %arg2: memref<5x32x32xbf16, #tpu.memory_space<vmem>>, %arg3: memref<5x32x1xf32, #tpu.memory_space<vmem>>, %arg4: memref<32x32xbf16, #tpu.memory_space<vmem>>) attributes {dimension_semantics = [#tpu.dimension_semantics<parallel>], iteration_bounds = array<i64: 1>, scalar_prefetch = 0 : i64, scratch_operands = 0 : i64, tpu.core_type = #tpu.core_type<tc>, window_params = [{transform_indices = @transform_0, window_bounds = array<i64: 32, 32>}, {pipeline_mode = #tpu.pipeline_mode<synchronous>, transform_indices = @transform_1, window_bounds = array<i64: 5, 32, 32>}, {pipeline_mode = #tpu.pipeline_mode<synchronous>, transform_indices = @transform_2, window_bounds = array<i64: 5, 32, 1>}, {transform_indices = @transform_3, window_bounds = array<i64: 32, 32>}]} {
    %c0 = arith.constant 0 : index
    %c0_0 = arith.constant 0 : index
    %0 = vector.load %arg1[%c0, %c0_0] : memref<32x32xbf16, #tpu.memory_space<vmem>>, vector<32x32xbf16>
    %c0_1 = arith.constant 0 : index
    %c0_2 = arith.constant 0 : index
    %c0_3 = arith.constant 0 : index
    %1 = vector.load %arg2[%c0_1, %c0_2, %c0_3] : memref<5x32x32xbf16, #tpu.memory_space<vmem>>, vector<1x32x32xbf16>
    %2 = vector.shape_cast %1 : vector<1x32x32xbf16> to vector<32x32xbf16>
    %cst = arith.constant dense<0.000000e+00> : vector<32x32xf32>
    %3 = tpu.matmul %2, %0, %cst {dimension_numbers = #tpu.dot_dimension_numbers<[1], [0], [0], [1], [0, 0, 1, 1], [], []>} : vector<32x32xbf16>, vector<32x32xbf16>, vector<32x32xf32> -> vector<32x32xf32>
    %c0_4 = arith.constant 0 : index
    %c0_5 = arith.constant 0 : index
    %c0_6 = arith.constant 0 : index
    %4 = vector.load %arg3[%c0_4, %c0_5, %c0_6] : memref<5x32x1xf32, #tpu.memory_space<vmem>>, vector<1x32x1xf32>
    %5 = vector.shape_cast %4 : vector<1x32x1xf32> to vector<32x1xf32>
    %6 = arith.truncf %3 : vector<32x32xf32> to vector<32x32xbf16>
    %7 = arith.truncf %5 : vector<32x1xf32> to vector<32x1xbf16>
    %8 = vector.broadcast %7 : vector<32x1xbf16> to vector<32x32xbf16>
    %9 = arith.addf %6, %8 : vector<32x32xbf16>
    %cst_7 = arith.constant 0.000000e+00 : bf16
    %10 = vector.broadcast %cst_7 : bf16 to vector<32x32xbf16>
    %11 = arith.maximumf %9, %10 : vector<32x32xbf16>
    %c1 = arith.constant 1 : index
    %c0_8 = arith.constant 0 : index
    %c0_9 = arith.constant 0 : index
    %12 = vector.load %arg2[%c1, %c0_8, %c0_9] : memref<5x32x32xbf16, #tpu.memory_space<vmem>>, vector<1x16x32xbf16>
    %13 = vector.shape_cast %12 : vector<1x16x32xbf16> to vector<16x32xbf16>
    %cst_10 = arith.constant dense<0.000000e+00> : vector<16x32xf32>
    %14 = tpu.matmul %13, %11, %cst_10 {dimension_numbers = #tpu.dot_dimension_numbers<[1], [0], [0], [1], [0, 0, 1, 1], [], []>} : vector<16x32xbf16>, vector<32x32xbf16>, vector<16x32xf32> -> vector<16x32xf32>
    %c1_11 = arith.constant 1 : index
    %c0_12 = arith.constant 0 : index
    %c0_13 = arith.constant 0 : index
    %15 = vector.load %arg3[%c1_11, %c0_12, %c0_13] : memref<5x32x1xf32, #tpu.memory_space<vmem>>, vector<1x16x1xf32>
    %16 = vector.shape_cast %15 : vector<1x16x1xf32> to vector<16x1xf32>
    %17 = arith.truncf %14 : vector<16x32xf32> to vector<16x32xbf16>
    %18 = arith.truncf %16 : vector<16x1xf32> to vector<16x1xbf16>
    %19 = vector.broadcast %18 : vector<16x1xbf16> to vector<16x32xbf16>
    %20 = arith.addf %17, %19 : vector<16x32xbf16>
    %cst_14 = arith.constant 0.000000e+00 : bf16
    %21 = vector.broadcast %cst_14 : bf16 to vector<16x32xbf16>
    %22 = arith.maximumf %20, %21 : vector<16x32xbf16>
    %c2 = arith.constant 2 : index
    %c0_15 = arith.constant 0 : index
    %c0_16 = arith.constant 0 : index
    %23 = vector.load %arg2[%c2, %c0_15, %c0_16] : memref<5x32x32xbf16, #tpu.memory_space<vmem>>, vector<1x8x16xbf16>
    %24 = vector.shape_cast %23 : vector<1x8x16xbf16> to vector<8x16xbf16>
    %cst_17 = arith.constant dense<0.000000e+00> : vector<8x32xf32>
    %25 = tpu.matmul %24, %22, %cst_17 {dimension_numbers = #tpu.dot_dimension_numbers<[1], [0], [0], [1], [0, 0, 1, 1], [], []>} : vector<8x16xbf16>, vector<16x32xbf16>, vector<8x32xf32> -> vector<8x32xf32>
    %c2_18 = arith.constant 2 : index
    %c0_19 = arith.constant 0 : index
    %c0_20 = arith.constant 0 : index
    %26 = vector.load %arg3[%c2_18, %c0_19, %c0_20] : memref<5x32x1xf32, #tpu.memory_space<vmem>>, vector<1x8x1xf32>
    %27 = vector.shape_cast %26 : vector<1x8x1xf32> to vector<8x1xf32>
    %28 = arith.truncf %25 : vector<8x32xf32> to vector<8x32xbf16>
    %29 = arith.truncf %27 : vector<8x1xf32> to vector<8x1xbf16>
    %30 = vector.broadcast %29 : vector<8x1xbf16> to vector<8x32xbf16>
    %31 = arith.addf %28, %30 : vector<8x32xbf16>
    %cst_21 = arith.constant 0.000000e+00 : bf16
    %32 = vector.broadcast %cst_21 : bf16 to vector<8x32xbf16>
    %33 = arith.maximumf %31, %32 : vector<8x32xbf16>
    %c3 = arith.constant 3 : index
    %c0_22 = arith.constant 0 : index
    %c0_23 = arith.constant 0 : index
    %34 = vector.load %arg2[%c3, %c0_22, %c0_23] : memref<5x32x32xbf16, #tpu.memory_space<vmem>>, vector<1x8x8xbf16>
    %35 = vector.shape_cast %34 : vector<1x8x8xbf16> to vector<8x8xbf16>
    %cst_24 = arith.constant dense<0.000000e+00> : vector<8x32xf32>
    %36 = tpu.matmul %35, %33, %cst_24 {dimension_numbers = #tpu.dot_dimension_numbers<[1], [0], [0], [1], [0, 0, 1, 1], [], []>} : vector<8x8xbf16>, vector<8x32xbf16>, vector<8x32xf32> -> vector<8x32xf32>
    %c3_25 = arith.constant 3 : index
    %c0_26 = arith.constant 0 : index
    %c0_27 = arith.constant 0 : index
    %37 = vector.load %arg3[%c3_25, %c0_26, %c0_27] : memref<5x32x1xf32, #tpu.memory_space<vmem>>, vector<1x8x1xf32>
    %38 = vector.shape_cast %37 : vector<1x8x1xf32> to vector<8x1xf32>
    %39 = arith.truncf %36 : vector<8x32xf32> to vector<8x32xbf16>
    %40 = arith.truncf %38 : vector<8x1xf32> to vector<8x1xbf16>
    %41 = vector.broadcast %40 : vector<8x1xbf16> to vector<8x32xbf16>
    %42 = arith.addf %39, %41 : vector<8x32xbf16>
    %cst_28 = arith.constant 0.000000e+00 : bf16
    %43 = vector.broadcast %cst_28 : bf16 to vector<8x32xbf16>
    %44 = arith.maximumf %42, %43 : vector<8x32xbf16>
    %c4 = arith.constant 4 : index
    %c0_29 = arith.constant 0 : index
    %c0_30 = arith.constant 0 : index
    %45 = vector.load %arg2[%c4, %c0_29, %c0_30] : memref<5x32x32xbf16, #tpu.memory_space<vmem>>, vector<1x32x8xbf16>
    %46 = vector.shape_cast %45 : vector<1x32x8xbf16> to vector<32x8xbf16>
    %cst_31 = arith.constant dense<0.000000e+00> : vector<32x32xf32>
    %47 = tpu.matmul %46, %44, %cst_31 {dimension_numbers = #tpu.dot_dimension_numbers<[1], [0], [0], [1], [0, 0, 1, 1], [], []>} : vector<32x8xbf16>, vector<8x32xbf16>, vector<32x32xf32> -> vector<32x32xf32>
    %c4_32 = arith.constant 4 : index
    %c0_33 = arith.constant 0 : index
    %c0_34 = arith.constant 0 : index
    %48 = vector.load %arg3[%c4_32, %c0_33, %c0_34] : memref<5x32x1xf32, #tpu.memory_space<vmem>>, vector<1x32x1xf32>
    %49 = vector.shape_cast %48 : vector<1x32x1xf32> to vector<32x1xf32>
    %50 = vector.broadcast %49 : vector<32x1xf32> to vector<32x32xf32>
    %51 = arith.addf %47, %50 : vector<32x32xf32>
    %52 = arith.truncf %51 : vector<32x32xf32> to vector<32x32xbf16>
    %c0_35 = arith.constant 0 : index
    %c0_36 = arith.constant 0 : index
    %53 = vector.load %arg4[%c0_35, %c0_36] : memref<32x32xbf16, #tpu.memory_space<vmem>>, vector<32x32xbf16>
    tpu.vector_store %arg4[%c0_35, %c0_36], %52 {strides = array<i32>} : memref<32x32xbf16, #tpu.memory_space<vmem>>, vector<32x32xbf16>,
    return
  }
  func.func @transform_0(%arg0: i32) -> (i32, i32) {
    %c0_i32 = arith.constant 0 : i32
    %c0_i32_0 = arith.constant 0 : i32
    return %c0_i32, %arg0 : i32, i32
  }
  func.func @transform_1(%arg0: i32) -> (i32, i32, i32) {
    %c0_i32 = arith.constant 0 : i32
    %c0_i32_0 = arith.constant 0 : i32
    %c0_i32_1 = arith.constant 0 : i32
    %c0_i32_2 = arith.constant 0 : i32
    return %c0_i32, %c0_i32_0, %c0_i32_1 : i32, i32, i32
  }
  func.func @transform_2(%arg0: i32) -> (i32, i32, i32) {
    %c0_i32 = arith.constant 0 : i32
    %c0_i32_0 = arith.constant 0 : i32
    %c0_i32_1 = arith.constant 0 : i32
    %c0_i32_2 = arith.constant 0 : i32
    return %c0_i32, %c0_i32_0, %c0_i32_1 : i32, i32, i32
  }
  func.func @transform_3(%arg0: i32) -> (i32, i32) {
    %c0_i32 = arith.constant 0 : i32
    %c0_i32_0 = arith.constant 0 : i32
    return %c0_i32, %arg0 : i32, i32
  }
}

</mosaic_0001>

<bundles_post_ra>
// kernel: create_level_forward.1
= control target key start
LH: loop header
LB: loop body
LE: loop exit
PB: predicated region body
PF: predicated region fallthrough
CT: control target
= control target key end

     0   :  { %v527_v1 = vmov 0   ;;  %vm45_vm0 = vcmask 261120   ;;  %v528_v15 = vmov 0.0   ;;  %vm529_vm1 = vmmov 0   ;;  %s644_s0 = inlined_call_operand.vmem [shape: bf16[32,32], index: 0, kind: input, shape index: {}]   ;;  %s645_s1 = inlined_call_operand.vmem [shape: bf16[5,32,32], index: 1, kind: input, shape index: {}]   ;;  %s646_s2 = inlined_call_operand.vmem [shape: f32[5,32,1], index: 2, kind: input, shape index: {}]   ;;  %s647_s3 = inlined_call_operand.vmem [shape: bf16[32,32], index: 3, kind: output, shape index: {}]  }
   0x1   :  { %v520_v0 = vld [vmem:[%s644_s0] sm:$0xff]   ;;  %518 = vset.pattern.permute.xlu0 %v527_v1  ;;  %519 = vset.pattern.permute.xlu1 %v527_v1  ;;  %v521_v2 = vld [vmem:[%s644_s0 + $0x8] sm:$0xff]   ;;  %v103_v6 = vld [vmem:[%s646_s2 + $0x10] sm:$0xff]  ;;  %vm189_vm2 = vcmask 130048   ;;  %vm250_vm3 = vcmask 1043456   ;;  %vm246_vm4 = vcmask 64512  }
   0x2   :  { %480 = vmatprep.subr.bf16.mxu0 %v520_v0  ;;  %v522_v3 = vld [vmem:[%s645_s1] sm:$0xff]   ;;  %v102_v5 = vld [vmem:[%s646_s2 + $0x8] sm:$0xff]  ;;  %v104_v8 = vld [vmem:[%s646_s2 + $0x18] sm:$0xff]  ;;  %488 = vmatprep.subr.bf16.mxu1 %v528_v15  ;;  %vm419_vm5 = vcmask 257024  }
   0x3   :  { %481 = vmatpush3.bf16.msra.mxu0 %v520_v0  ;;  %484 = vmatprep.mubr.msk.bf16.mxu0 %vm45_vm0, %v522_v3  ;;  %v101_v4 = vld [vmem:[%s646_s2] sm:$0xff]  ;;  %v523_v9 = vld [vmem:[%s645_s1 + $0x8] sm:$0xff]   ;;  %v108_v10 = vpack.c.bf16 %v104_v8, %v103_v6  ;;  %v453_v14 = vld [vmem:[%s646_s2 + $0x98] sm:$0xff] }
   0x4   :  { %482 = vmatprep.subr.bf16.mxu0 %v521_v2  ;;  %v107_v7 = vpack.c.bf16 %v102_v5, %v101_v4  ;;  %v445_v11 = vld [vmem:[%s646_s2 + $0x60] sm:$0xff]  ;;  %v451_v13 = vld [vmem:[%s646_s2 + $0x88] sm:$0xff]  ;;  %492 = vmatprep.mubr.msk.bf16.mxu1 %vm529_vm1, %v528_v15  ;;  %v452_v22 = vld [vmem:[%s646_s2 + $0x90] sm:$0xff] }
   0x5   :  { %v297_v12 = vpack.c.bf16 %v445_v11, %v445_v11  ;;  %v438_v16 = vld [vmem:[%s646_s2 + $0x20] sm:$0xff]  ;;  %v439_v17 = vld [vmem:[%s646_s2 + $0x28] sm:$0xff]  ;;  %v524_v35 = vld [vmem:[%s645_s1 + $0x10] sm:$0xff]  }
   0x6   :  { %111 = vperm.xlu0 %518, %v107_v7   ;;  %v442_v18 = vld [vmem:[%s646_s2 + $0x40] sm:$0xff]  ;;  %v179_v19 = vpack.c.bf16 %v439_v17, %v438_v16  ;;  %v443_v54 = vld [vmem:[%s645_s1 + $0x30] sm:$0xf] }
   0x7   :  { %483 = vmatpush3.bf16.msra.mxu0 %v521_v2  ;;  %v236_v20 = vpack.c.bf16 %v442_v18, %v442_v18  ;;  %v450_v21 = vld [vmem:[%s646_s2 + $0x80] sm:$0xff]  ;;  %v526_v2 = vld [vmem:[%s645_s1 + $0x48] sm:$0xff]  }
   0x8   :  { %496 = vmatprep.subr.bf16.mxu0 %v528_v15  ;;  %182 = vperm.xlu1 %519, %v179_v19   ;;  %v440_v44 = vld [vmem:[%s645_s1 + $0x20] sm:$0xf] }
   0x9   :  { %v525_v55 = vld [vmem:[%s645_s1 + $0x40] sm:$0xff]  }
   0xa   :  { %485 = vmatmul.mubr.msk.bf16.vlgmr.msra.gmra.mrb[0].mxu0 %vm45_vm0, %v523_v9  ;;  %116 = vperm.xlu0 %518, %v108_v10  }
   0xb   :  { %498 = vmatprep.mubr.msk.bf16.mxu0 %vm529_vm1, %v528_v15 }
   0xc   :  { %239 = vperm.xlu1 %519, %v236_v20  }
   0xe   :  { %300 = vperm.xlu0 %518, %v297_v12  }
  0x10   :  { %317 = vperm.xlu1 %519, %v450_v21  }
  0x12   :  { %322 = vperm.xlu0 %518, %v451_v13  }
  0x14   :  { %327 = vperm.xlu1 %519, %v452_v22  }
  0x16   :  { %332 = vperm.xlu0 %518, %v453_v14  }
  0x85   :  { %v112_v24 = vpop.permute.xlu0 %111 }
  0x87   :  { %v183_v41 = vpop.permute.xlu1 %182 }
  0x89   :  { %v117_v31 = vpop.permute.xlu0 %116 }
  0x8b   :  { %v240_v48 = vpop.permute.xlu1 %239 }
  0x8d   :  { %v301_v59 = vpop.permute.xlu0 %300 }
  0x8f   :  { %v318_v3 = vpop.permute.xlu1 %317 }
  0x91   :  { %v323_v4 = vpop.permute.xlu0 %322 }
  0x93   :  { %v328_v5 = vpop.permute.xlu1 %327 }
  0x95   :  { %v333_v9 = vpop.permute.xlu0 %332 }
  0xdd   :  { %v486_v23 = vpop.f32.mrb[0].mxu0 }
  0xde   :  { %v86_v25 = vpop.f32.mrb[1].mxu0 }
  0xdf   :  { %v487_v26 = vpop.f32.mrb[2].mxu0 }
  0xe0   :  { %v106_v27 = vpack.c.bf16 %v487_v26, %v486_v23  ;;  %v89_v28 = vpop.f32.mrb[3].mxu0 }
  0xe1   :  { %v105_v29 = vpack.c.bf16 %v89_v28, %v86_v25 }
  0xe2   :  { %v120_v32 = vadd.bf16 %v117_v31, %v106_v27 }
  0xe3   :  { %v119_v30 = vadd.bf16 %v112_v24, %v105_v29 }
  0xe4   :  { %v122_v34 = vmax.bf16 %v527_v1, %v120_v32 }
  0xe5   :  { %v121_v33 = vmax.bf16 %v527_v1, %v119_v30 }
  0xe7   :  { %489 = vmatpush3.bf16.msra.mxu1 %v121_v33 }
  0xe8   :  { %490 = vmatprep.subr.bf16.mxu1 %v528_v15 }
  0xeb   :  { %491 = vmatpush3.bf16.msra.mxu1 %v122_v34 }
  0xec   :  { %502 = vmatprep.subr.bf16.mxu1 %v528_v15 }
  0xee   :  { %493 = vmatmul.mubr.msk.bf16.vlgmr.msra.gmra.mrb[0].mxu1 %vm45_vm0, %v524_v35 }
  0xef   :  { %504 = vmatprep.mubr.msk.bf16.mxu1 %vm529_vm1, %v528_v15 }
 0x1c1   :  { %v168_v36 = vpop.f32.mrb[0].mxu1 }
 0x1c2   :  { %v494_v37 = vpop.f32.mrb[1].mxu1 }
 0x1c3   :  { %v171_v38 = vpop.f32.mrb[2].mxu1 }
 0x1c4   :  { %v178_v39 = vpack.c.bf16 %v171_v38, %v168_v36  ;;  %v495_v40 = vpop.f32.mrb[3].mxu1 }
 0x1c6   :  { %v185_v42 = vadd.bf16 %v183_v41, %v178_v39 }
 0x1c8   :  { %v186_v43 = vmax.bf16 %v527_v1, %v185_v42 }
 0x1ca   :  { %497 = vmatpush3.bf16.msra.mxu0 %v186_v43 }
 0x1cd   :  { %499 = vmatmul.mubr.msk.bf16.vlgmr.msra.gmra.mrb[4].mxu0 %vm189_vm2, %v440_v44 }
 0x1ce   :  { %510 = vmatprep.mubr.msk.bf16.mxu0 %vm246_vm4, %v525_v55 }
 0x2a0   :  { %v227_v45 = vpop.f32.mrb[4].mxu0 }
 0x2a1   :  { %v235_v46 = vpack.c.bf16 %v227_v45, %v227_v45  ;;  %v500_v47 = vpop.f32.mrb[5].mxu0 }
 0x2a2   :  { %v230_v49 = vpop.f32.mrb[6].mxu0 }
 0x2a3   :  { %v242_v50 = vadd.bf16 %v240_v48, %v235_v46  ;;  %v501_v51 = vpop.f32.mrb[7].mxu0 }
 0x2a5   :  { %v243_v52 = vmax.bf16 %v527_v1, %v242_v50 }
 0x2a7   :  { %v252_v53 = vsel %vm250_vm3, %v243_v52, 0 }
 0x2a8   :  { %503 = vmatpush3.bf16.msra.mxu1 %v252_v53 }
 0x2ab   :  { %505 = vmatmul.mubr.msk.bf16.vlgmr.msra.gmra.mrb[4].mxu1 %vm246_vm4, %v443_v54 }
 0x37e   :  { %v288_v56 = vpop.f32.mrb[4].mxu1 }
 0x37f   :  { %v296_v57 = vpack.c.bf16 %v288_v56, %v288_v56  ;;  %v506_v58 = vpop.f32.mrb[5].mxu1 }
 0x380   :  { %v291_v60 = vpop.f32.mrb[6].mxu1 }
 0x381   :  { %v303_v61 = vadd.bf16 %v301_v59, %v296_v57  ;;  %v507_v62 = vpop.f32.mrb[7].mxu1 }
 0x383   :  { %v304_v63 = vmax.bf16 %v527_v1, %v303_v61 }
 0x385   :  { %514 = vmatprep.subr.msk.bf16.mxu0 %vm250_vm3, %v304_v63  ;;  %v352_v0 = vsel %vm250_vm3, %v304_v63, 0 }
 0x386   :  { %509 = vmatpush3.bf16.msra.mxu0 %v352_v0 }
 0x389   :  { %511 = vmatmul.mubr.msk.bf16.vlgmr.msra.gmra.mrb[8].mxu0 %vm246_vm4, %v526_v2 }
 0x45c   :  { %v512_v6 = vpop.f32.mrb[8].mxu0 }
 0x45d   :  { %v397_v7 = vadd.f32 %v512_v6, %v328_v5  ;;  %v388_v8 = vpop.f32.mrb[9].mxu0 }
 0x45e   :  { %v389_v1 = vadd.f32 %v388_v8, %v318_v3  ;;  %v513_v10 = vpop.f32.mrb[10].mxu0 }
 0x45f   :  { %v464_v11 = vpack.c.bf16 %v397_v7, %v397_v7  ;;  %v400_v12 = vadd.f32 %v513_v10, %v333_v9  ;;  %v391_v13 = vpop.f32.mrb[11].mxu0 }
 0x460   :  { %v462_v14 = vpack.c.bf16 %v389_v1, %v389_v1  ;;  %v392_v15 = vadd.f32 %v391_v13, %v323_v4 }
 0x461   :  { %422 = vst.msk [vmem:[%s647_s3 + $0x8] sm:$0xf] %vm419_vm5, %v464_v11  ;;  %v465_v16 = vpack.c.bf16 %v400_v12, %v400_v12 }
 0x462   :  { %420 = vst.msk [vmem:[%s647_s3] sm:$0xf] %vm419_vm5, %v462_v14  ;;  %v463_v17 = vpack.c.bf16 %v392_v15, %v392_v15 }
 0x463   :  { %423 = vst.msk [vmem:[%s647_s3 + $0xc] sm:$0xf] %vm419_vm5, %v465_v16 }
 0x464   :  { %421 = vst.msk [vmem:[%s647_s3 + $0x4] sm:$0xf] %vm419_vm5, %v463_v17 }

</bundles_post_ra>
